<compile_context>
chip_gen: v7x
topology: tpu7x:2x2x1
jax: 0.10.0
libtpu: 0.0.40
codegen_flags: <defaults>
</compile_context>

<pallas_src>
import functools
import math

import jax
import jax.numpy as jnp
from jax import lax
from jax.experimental import pallas as pl
from jax.experimental.pallas import tpu as pltpu


def _softmoe_kernel(x_ref, phi_ref, w_ref, b_ref, o_ref,
                    slots_sc, y_sc, cmb_sc, *, p, ne):
    """One (batch element, expert block) grid step.

    x_ref:    (1, m, d)        current batch element (input dtype)
    phi_ref:  (d, n*p)         slot embeddings (resident, input dtype)
    w_ref:    (ne, d, d_out)   streamed block of expert weights
    b_ref:    (n, d_out)       expert biases (tiny, fully resident)
    o_ref:    (1, m, d_out)    output block (resident across the expert axis)

    slots_sc: (n*p, d)         dispatch-normalised slot inputs
    y_sc:     (n*p, d_out)     per-slot expert outputs
    cmb_sc:   (m, n*p)         combine weights (row-softmax, already normalised)
    """
    e_blk = pl.program_id(1)
    last_blk = pl.num_programs(1) - 1
    io_dtype = x_ref.dtype

    # ---- once per batch element: logits, softmax stats, dispatch matmul ----
    @pl.when(e_blk == 0)
    def _dispatch():
        x = x_ref[0]                                   # (m, d)   input dtype
        phi = phi_ref[...]                             # (d, S)   input dtype
        # f32 accumulation on the MXU; operands stay in their input dtype.
        logits = jnp.dot(x, phi, preferred_element_type=jnp.float32)   # (m, S)

        # Dispatch softmax over the sequence dim m (axis 0).  Normalisation is
        # folded into a per-slot (S, 1) scaling of the matmul output instead of
        # normalising the full (m, S) weights.
        d_exp = jnp.exp(logits - jnp.max(logits, axis=0, keepdims=True))
        dcast = d_exp.astype(io_dtype)                 # bf16 MXU path for bf16 inputs
        ones_m = jnp.ones((x.shape[0], 1), dtype=io_dtype)
        dn = (((0,), (0,)), ((), ()))                  # contract dim 0 of both operands
        # slots = dispatch^T @ x without materialising a transpose.
        slots = lax.dot_general(dcast, x, dn,
                                preferred_element_type=jnp.float32)        # (S, d)
        # Column sums come out already in (S, 1) orientation (no relayout).
        col_sum = lax.dot_general(dcast, ones_m, dn,
                                  preferred_element_type=jnp.float32)      # (S, 1)
        slots_sc[...] = (slots * pl.reciprocal(col_sum, approx=True)).astype(io_dtype)

        # Combine softmax over the n*p slots (axis 1); fold the (m, 1)
        # reciprocal row-sum into the weights in f32 before casting, so the
        # combine step is a single matmul with no trailing broadcast multiply.
        c_exp = jnp.exp(logits - jnp.max(logits, axis=1, keepdims=True))
        c_inv = pl.reciprocal(jnp.sum(c_exp, axis=1, keepdims=True), approx=True)
        cmb_sc[...] = (c_exp * c_inv).astype(io_dtype)

    # ---- every step: this block's experts, one (p, d) @ (d, d_out) each ----
    def expert_body(j, carry):
        e = e_blk * ne + j                             # global expert index
        row = pl.multiple_of(e * p, p)
        w_e = w_ref[j]                                 # (d, d_out)  streamed weights
        s_e = slots_sc[pl.ds(row, p), :]               # (p, d)
        b_e = b_ref[pl.ds(e, 1), :]                    # (1, d_out)
        y_e = jnp.dot(s_e, w_e, preferred_element_type=jnp.float32) + b_e
        y_sc[pl.ds(row, p), :] = y_e.astype(y_sc.dtype)
        return carry

    lax.fori_loop(0, ne, expert_body, 0, unroll=True)

    # ---- last expert block: single lane-dense combine matmul -> output ----
    @pl.when(e_blk == last_blk)
    def _combine():
        out = jnp.dot(cmb_sc[...], y_sc[...], preferred_element_type=jnp.float32)
        o_ref[0] = out.astype(o_ref.dtype)


def soft_moe(x, phi, expert_w, expert_b, *, experts_per_block=None):
    """SoftMoE forward.

    x: (b, m, d); phi: (d, n, p); expert_w: (n, d, d_out); expert_b: (n, d_out).
    Returns (b, m, d_out).
    """
    b, m, d = x.shape
    d_phi, n, p = phi.shape
    assert d_phi == d
    n_w, d_w, d_out = expert_w.shape
    assert n_w == n and d_w == d
    assert expert_b.shape == (n, d_out)

    if experts_per_block is None:
        experts_per_block = next(c for c in (8, 4, 2, 1) if n % c == 0)
    ne = experts_per_block
    assert n % ne == 0, "experts_per_block must divide num_experts"
    n_blocks = n // ne
    s = n * p

    phi_flat = phi.reshape(d, s)          # glue reshape outside the kernel
    io_dtype = x.dtype

    kernel = functools.partial(_softmoe_kernel, p=p, ne=ne)

    return pl.pallas_call(
        kernel,
        out_shape=jax.ShapeDtypeStruct((b, m, d_out), x.dtype),
        grid_spec=pltpu.PrefetchScalarGridSpec(
            num_scalar_prefetch=0,
            grid=(b, n_blocks),
            in_specs=[
                # x / phi block indices are constant across the expert axis, so
                # they are only re-DMA'd when the batch index changes.
                pl.BlockSpec((1, m, d), lambda i, e: (i, 0, 0)),
                pl.BlockSpec((d, s), lambda i, e: (0, 0)),
                # Expert weights are streamed one block of `ne` experts per step.
                pl.BlockSpec((ne, d, d_out), lambda i, e: (e, 0, 0)),
                # Biases are tiny; keep all of them resident.
                pl.BlockSpec((n, d_out), lambda i, e: (0, 0)),
            ],
            out_specs=pl.BlockSpec((1, m, d_out), lambda i, e: (i, 0, 0)),
            scratch_shapes=[
                pltpu.VMEM((s, d), io_dtype),        # dispatch-normalised slots
                pltpu.VMEM((s, d_out), io_dtype),    # per-slot expert outputs
                pltpu.VMEM((m, s), io_dtype),        # normalised combine weights
            ],
        ),
        compiler_params=pltpu.CompilerParams(
            dimension_semantics=("parallel", "arbitrary"),
            vmem_limit_bytes=48 * 1024 * 1024,
        ),
    )(x, phi_flat, expert_w, expert_b)


def soft_moe_reference(x, phi, expert_w, expert_b):
    """Pure-JAX reference mirroring the PyTorch SoftMoE forward."""
    logits = jnp.einsum("bmd,dnp->bmnp", x, phi)
    dispatch = jax.nn.softmax(logits, axis=1)
    b, m, n, p = logits.shape
    combine = jax.nn.softmax(logits.reshape(b, m, n * p), axis=-1).reshape(b, m, n, p)
    slots = jnp.einsum("bmd,bmnp->bnpd", x, dispatch)
    y = jnp.einsum("bnpd,nde->bnpe", slots, expert_w) + expert_b[None, :, None, :]
    return jnp.einsum("bnpe,bmnp->bme", y, combine)


if __name__ == "__main__":
    B, M, D = 2, 8, 32          # batch, seq len, in_features
    N, P = 4, 2                 # num_experts, slots_per_expert
    D_OUT = 32                  # out_features

    key = jax.random.PRNGKey(0)
    kx, kphi, kw, kb = jax.random.split(key, 4)

    x = jax.random.normal(kx, (B, M, D), dtype=jnp.float32)
    # Deterministic kaiming-uniform-like init (a=sqrt(5) -> bound = 1/sqrt(fan_in)).
    phi_bound = 1.0 / math.sqrt(N * P)
    phi = jax.random.uniform(kphi, (D, N, P), minval=-phi_bound, maxval=phi_bound,
                             dtype=jnp.float32)
    w_bound = 1.0 / math.sqrt(D)
    expert_w = jax.random.uniform(kw, (N, D, D_OUT), minval=-w_bound, maxval=w_bound,
                                  dtype=jnp.float32)
    expert_b = jax.random.uniform(kb, (N, D_OUT), minval=-w_bound, maxval=w_bound,
                                  dtype=jnp.float32)

    # f32 path (experts streamed in blocks of 2 so the expert grid axis is > 1).
    out = jax.block_until_ready(soft_moe(x, phi, expert_w, expert_b,
                                         experts_per_block=2))
    ref = soft_moe_reference(x, phi, expert_w, expert_b)
    assert out.shape == (B, M, D_OUT)
    # approx (EUP) reciprocals in the softmax normalisation loosen the tolerance
    # slightly vs a pure-f32 reference.
    err = float(jnp.max(jnp.abs(out - ref)))
    assert jnp.allclose(out, ref, atol=2e-3, rtol=2e-3), f"f32 max err {err}"

    # bf16 fast path: operands stay bf16 on the MXU, accumulation in f32.
    xb = x.astype(jnp.bfloat16)
    phib = phi.astype(jnp.bfloat16)
    wb = expert_w.astype(jnp.bfloat16)
    bb = expert_b.astype(jnp.bfloat16)
    out_bf16 = jax.block_until_ready(soft_moe(xb, phib, wb, bb, experts_per_block=2))
    ref_bf16 = soft_moe_reference(xb.astype(jnp.float32), phib.astype(jnp.float32),
                                  wb.astype(jnp.float32), bb.astype(jnp.float32))
    err_b = float(jnp.max(jnp.abs(out_bf16.astype(jnp.float32) - ref_bf16)))
    assert jnp.allclose(out_bf16.astype(jnp.float32), ref_bf16,
                        atol=5e-2, rtol=5e-2), f"bf16 max err {err_b}"

    print("KERNEL_OK")
</pallas_src>

<mosaic_0001>
module attributes {stable_mosaic.version = 11 : i64} {
  func.func @_softmoe_kernel(%arg0: i32, %arg1: i32, %arg2: memref<1x8x32xf32, #tpu.memory_space<vmem>>, %arg3: memref<32x8xf32, #tpu.memory_space<vmem>>, %arg4: memref<2x32x32xf32, #tpu.memory_space<vmem>>, %arg5: memref<4x32xf32, #tpu.memory_space<vmem>>, %arg6: memref<1x8x32xf32, #tpu.memory_space<vmem>>, %arg7: memref<8x32xf32, #tpu.memory_space<vmem>>, %arg8: memref<8x32xf32, #tpu.memory_space<vmem>>, %arg9: memref<8x8xf32, #tpu.memory_space<vmem>>) attributes {dimension_semantics = [#tpu.dimension_semantics<parallel>, #tpu.dimension_semantics<arbitrary>], iteration_bounds = array<i64: 2, 2>, scalar_prefetch = 0 : i64, scratch_operands = 3 : i64, tpu.core_type = #tpu.core_type<tc>, window_params = [{transform_indices = @transform_0, window_bounds = array<i64: 1, 8, 32>}, {pipeline_mode = #tpu.pipeline_mode<synchronous>, transform_indices = @transform_1, window_bounds = array<i64: 32, 8>}, {transform_indices = @transform_2, window_bounds = array<i64: 2, 32, 32>}, {pipeline_mode = #tpu.pipeline_mode<synchronous>, transform_indices = @transform_3, window_bounds = array<i64: 4, 32>}, {transform_indices = @transform_4, window_bounds = array<i64: 1, 8, 32>}]} {
    %c0_i32 = arith.constant 0 : i32
    %0 = arith.cmpi eq, %arg1, %c0_i32 : i32
    %1 = arith.extui %0 : i1 to i32
    %c0_i32_0 = arith.constant 0 : i32
    %2 = arith.cmpi ne, %1, %c0_i32_0 : i32
    scf.if %2 {
      %c0_18 = arith.constant 0 : index
      %c0_19 = arith.constant 0 : index
      %c0_20 = arith.constant 0 : index
      %38 = vector.load %arg2[%c0_18, %c0_19, %c0_20] : memref<1x8x32xf32, #tpu.memory_space<vmem>>, vector<1x8x32xf32>
      %39 = vector.shape_cast %38 : vector<1x8x32xf32> to vector<8x32xf32>
      %c0_21 = arith.constant 0 : index
      %c0_22 = arith.constant 0 : index
      %40 = vector.load %arg3[%c0_21, %c0_22] : memref<32x8xf32, #tpu.memory_space<vmem>>, vector<32x8xf32>
      %cst_23 = arith.constant dense<0.000000e+00> : vector<8x8xf32>
      %41 = tpu.matmul %39, %40, %cst_23 {dimension_numbers = #tpu.dot_dimension_numbers<[1], [0], [0], [1], [0, 0, 1, 1], [], []>} : vector<8x32xf32>, vector<32x8xf32>, vector<8x8xf32> -> vector<8x8xf32>
      %cst_24 = arith.constant dense<0xFF800000> : vector<8xf32>
      %42 = vector.multi_reduction <maximumf>, %41, %cst_24 [0] : vector<8x8xf32> to vector<8xf32>
      %43 = vector.shape_cast %42 : vector<8xf32> to vector<1x8xf32>
      %44 = vector.broadcast %43 : vector<1x8xf32> to vector<8x8xf32>
      %45 = arith.subf %41, %44 : vector<8x8xf32>
      %46 = math.exp %45 : vector<8x8xf32>
      %cst_25 = arith.constant 1.000000e+00 : f32
      %47 = vector.broadcast %cst_25 : f32 to vector<8x1xf32>
      %cst_26 = arith.constant dense<0.000000e+00> : vector<8x32xf32>
      %48 = tpu.matmul %46, %39, %cst_26 {dimension_numbers = #tpu.dot_dimension_numbers<[0], [0], [1], [1], [0, 1, 1, 1], [], []>} : vector<8x8xf32>, vector<8x32xf32>, vector<8x32xf32> -> vector<8x32xf32>
      %cst_27 = arith.constant dense<0.000000e+00> : vector<8x1xf32>
      %49 = tpu.matmul %46, %47, %cst_27 {dimension_numbers = #tpu.dot_dimension_numbers<[0], [0], [1], [1], [0, 1, 1, 1], [], []>} : vector<8x8xf32>, vector<8x1xf32>, vector<8x1xf32> -> vector<8x1xf32>
      %50 = tpu.reciprocal %49 {approx = true} : vector<8x1xf32> -> vector<8x1xf32>
      %51 = vector.broadcast %50 : vector<8x1xf32> to vector<8x32xf32>
      %52 = arith.mulf %48, %51 : vector<8x32xf32>
      %c0_28 = arith.constant 0 : index
      %c0_29 = arith.constant 0 : index
      %53 = vector.load %arg7[%c0_28, %c0_29] : memref<8x32xf32, #tpu.memory_space<vmem>>, vector<8x32xf32>
      tpu.vector_store %arg7[%c0_28, %c0_29], %52 {strides = array<i32>} : memref<8x32xf32, #tpu.memory_space<vmem>>, vector<8x32xf32>,
      %cst_30 = arith.constant dense<0xFF800000> : vector<8xf32>
      %54 = vector.multi_reduction <maximumf>, %41, %cst_30 [1] : vector<8x8xf32> to vector<8xf32>
      %55 = vector.shape_cast %54 : vector<8xf32> to vector<8x1xf32>
      %56 = vector.broadcast %55 : vector<8x1xf32> to vector<8x8xf32>
      %57 = arith.subf %41, %56 : vector<8x8xf32>
      %58 = math.exp %57 : vector<8x8xf32>
      %cst_31 = arith.constant dense<0.000000e+00> : vector<8xf32>
      %59 = vector.multi_reduction <add>, %58, %cst_31 [1] : vector<8x8xf32> to vector<8xf32>
      %60 = vector.shape_cast %59 : vector<8xf32> to vector<8x1xf32>
      %61 = tpu.reciprocal %60 {approx = true} : vector<8x1xf32> -> vector<8x1xf32>
      %62 = vector.broadcast %61 : vector<8x1xf32> to vector<8x8xf32>
      %63 = arith.mulf %58, %62 : vector<8x8xf32>
      %c0_32 = arith.constant 0 : index
      %c0_33 = arith.constant 0 : index
      %64 = vector.load %arg9[%c0_32, %c0_33] : memref<8x8xf32, #tpu.memory_space<vmem>>, vector<8x8xf32>
      tpu.vector_store %arg9[%c0_32, %c0_33], %63 {strides = array<i32>} : memref<8x8xf32, #tpu.memory_space<vmem>>, vector<8x8xf32>,
    } else {
    }
    %c0_i32_1 = arith.constant 0 : i32
    %c2_i32 = arith.constant 2 : i32
    %3 = arith.muli %arg1, %c2_i32 : i32
    %4 = arith.addi %3, %c0_i32_1 : i32
    %c2_i32_2 = arith.constant 2 : i32
    %5 = arith.muli %4, %c2_i32_2 : i32
    %6 = tpu.assume_multiple %5, 2 : i32
    %7 = arith.index_cast %c0_i32_1 : i32 to index
    %c0 = arith.constant 0 : index
    %c0_3 = arith.constant 0 : index
    %8 = vector.load %arg4[%7, %c0, %c0_3] : memref<2x32x32xf32, #tpu.memory_space<vmem>>, vector<1x32x32xf32>
    %9 = vector.shape_cast %8 : vector<1x32x32xf32> to vector<32x32xf32>
    %10 = arith.index_cast %6 : i32 to index
    %c0_4 = arith.constant 0 : index
    %11 = vector.load %arg7[%10, %c0_4] : memref<8x32xf32, #tpu.memory_space<vmem>>, vector<2x32xf32>
    %12 = arith.index_cast %4 : i32 to index
    %c0_5 = arith.constant 0 : index
    %13 = vector.load %arg5[%12, %c0_5] : memref<4x32xf32, #tpu.memory_space<vmem>>, vector<1x32xf32>
    %cst = arith.constant dense<0.000000e+00> : vector<2x32xf32>
    %14 = tpu.matmul %11, %9, %cst {dimension_numbers = #tpu.dot_dimension_numbers<[1], [0], [0], [1], [0, 0, 1, 1], [], []>} : vector<2x32xf32>, vector<32x32xf32>, vector<2x32xf32> -> vector<2x32xf32>
    %15 = vector.broadcast %13 : vector<1x32xf32> to vector<2x32xf32>
    %16 = arith.addf %14, %15 : vector<2x32xf32>
    %17 = arith.index_cast %6 : i32 to index
    %c0_6 = arith.constant 0 : index
    %18 = vector.load %arg8[%17, %c0_6] : memref<8x32xf32, #tpu.memory_space<vmem>>, vector<2x32xf32>
    tpu.vector_store %arg8[%17, %c0_6], %16 {strides = array<i32>} : memref<8x32xf32, #tpu.memory_space<vmem>>, vector<2x32xf32>,
    %c1_i32 = arith.constant 1 : i32
    %c2_i32_7 = arith.constant 2 : i32
    %19 = arith.muli %arg1, %c2_i32_7 : i32
    %20 = arith.addi %19, %c1_i32 : i32
    %c2_i32_8 = arith.constant 2 : i32
    %21 = arith.muli %20, %c2_i32_8 : i32
    %22 = tpu.assume_multiple %21, 2 : i32
    %23 = arith.index_cast %c1_i32 : i32 to index
    %c0_9 = arith.constant 0 : index
    %c0_10 = arith.constant 0 : index
    %24 = vector.load %arg4[%23, %c0_9, %c0_10] : memref<2x32x32xf32, #tpu.memory_space<vmem>>, vector<1x32x32xf32>
    %25 = vector.shape_cast %24 : vector<1x32x32xf32> to vector<32x32xf32>
    %26 = arith.index_cast %22 : i32 to index
    %c0_11 = arith.constant 0 : index
    %27 = vector.load %arg7[%26, %c0_11] : memref<8x32xf32, #tpu.memory_space<vmem>>, vector<2x32xf32>
    %28 = arith.index_cast %20 : i32 to index
    %c0_12 = arith.constant 0 : index
    %29 = vector.load %arg5[%28, %c0_12] : memref<4x32xf32, #tpu.memory_space<vmem>>, vector<1x32xf32>
    %cst_13 = arith.constant dense<0.000000e+00> : vector<2x32xf32>
    %30 = tpu.matmul %27, %25, %cst_13 {dimension_numbers = #tpu.dot_dimension_numbers<[1], [0], [0], [1], [0, 0, 1, 1], [], []>} : vector<2x32xf32>, vector<32x32xf32>, vector<2x32xf32> -> vector<2x32xf32>
    %31 = vector.broadcast %29 : vector<1x32xf32> to vector<2x32xf32>
    %32 = arith.addf %30, %31 : vector<2x32xf32>
    %33 = arith.index_cast %22 : i32 to index
    %c0_14 = arith.constant 0 : index
    %34 = vector.load %arg8[%33, %c0_14] : memref<8x32xf32, #tpu.memory_space<vmem>>, vector<2x32xf32>
    tpu.vector_store %arg8[%33, %c0_14], %32 {strides = array<i32>} : memref<8x32xf32, #tpu.memory_space<vmem>>, vector<2x32xf32>,
    %c2_i32_15 = arith.constant 2 : i32
    %c1_i32_16 = arith.constant 1 : i32
    %35 = arith.cmpi eq, %arg1, %c1_i32_16 : i32
    %36 = arith.extui %35 : i1 to i32
    %c0_i32_17 = arith.constant 0 : i32
    %37 = arith.cmpi ne, %36, %c0_i32_17 : i32
    scf.if %37 {
      %c0_18 = arith.constant 0 : index
      %c0_19 = arith.constant 0 : index
      %38 = vector.load %arg9[%c0_18, %c0_19] : memref<8x8xf32, #tpu.memory_space<vmem>>, vector<8x8xf32>
      %c0_20 = arith.constant 0 : index
      %c0_21 = arith.constant 0 : index
      %39 = vector.load %arg8[%c0_20, %c0_21] : memref<8x32xf32, #tpu.memory_space<vmem>>, vector<8x32xf32>
      %cst_22 = arith.constant dense<0.000000e+00> : vector<8x32xf32>
      %40 = tpu.matmul %38, %39, %cst_22 {dimension_numbers = #tpu.dot_dimension_numbers<[1], [0], [0], [1], [0, 0, 1, 1], [], []>} : vector<8x8xf32>, vector<8x32xf32>, vector<8x32xf32> -> vector<8x32xf32>
      %c0_23 = arith.constant 0 : index
      %c0_24 = arith.constant 0 : index
      %c0_25 = arith.constant 0 : index
      %41 = vector.load %arg6[%c0_23, %c0_24, %c0_25] : memref<1x8x32xf32, #tpu.memory_space<vmem>>, vector<1x8x32xf32>
      %42 = vector.shape_cast %41 : vector<1x8x32xf32> to vector<8x32xf32>
      %43 = vector.shape_cast %40 : vector<8x32xf32> to vector<1x8x32xf32>
      tpu.vector_store %arg6[%c0_23, %c0_24, %c0_25], %43 {strides = array<i32>} : memref<1x8x32xf32, #tpu.memory_space<vmem>>, vector<1x8x32xf32>,
    } else {
    }
    return
  }
  func.func @transform_0(%arg0: i32, %arg1: i32) -> (i32, i32, i32) {
    %c0_i32 = arith.constant 0 : i32
    %c0_i32_0 = arith.constant 0 : i32
    %c0_i32_1 = arith.constant 0 : i32
    return %arg0, %c0_i32, %c0_i32_0 : i32, i32, i32
  }
  func.func @transform_1(%arg0: i32, %arg1: i32) -> (i32, i32) {
    %c0_i32 = arith.constant 0 : i32
    %c0_i32_0 = arith.constant 0 : i32
    %c0_i32_1 = arith.constant 0 : i32
    return %c0_i32, %c0_i32_0 : i32, i32
  }
  func.func @transform_2(%arg0: i32, %arg1: i32) -> (i32, i32, i32) {
    %c0_i32 = arith.constant 0 : i32
    %c0_i32_0 = arith.constant 0 : i32
    %c0_i32_1 = arith.constant 0 : i32
    return %arg1, %c0_i32, %c0_i32_0 : i32, i32, i32
  }
  func.func @transform_3(%arg0: i32, %arg1: i32) -> (i32, i32) {
    %c0_i32 = arith.constant 0 : i32
    %c0_i32_0 = arith.constant 0 : i32
    %c0_i32_1 = arith.constant 0 : i32
    return %c0_i32, %c0_i32_0 : i32, i32
  }
  func.func @transform_4(%arg0: i32, %arg1: i32) -> (i32, i32, i32) {
    %c0_i32 = arith.constant 0 : i32
    %c0_i32_0 = arith.constant 0 : i32
    %c0_i32_1 = arith.constant 0 : i32
    return %arg0, %c0_i32, %c0_i32_0 : i32, i32, i32
  }
}

</mosaic_0001>

<bundles_post_ra>
// kernel: tpu_custom_call.1
= control target key start
LH: loop header
LB: loop body
LE: loop exit
PB: predicated region body
PF: predicated region fallthrough
CT: control target
= control target key end

     0   :  { %s1641_s0 = inlined_call_operand.vmem [shape: f32[2,8,32], index: 0, kind: input, shape index: {}]   ;;  %s1642_s1 = inlined_call_operand.vmem [shape: f32[32,8], index: 1, kind: input, shape index: {}]   ;;  %s1643_s2 = inlined_call_operand.hbm [shape: f32[4,32,32], index: 2, kind: input, shape index: {}]   ;;  %s1644_s3 = inlined_call_operand.vmem [shape: f32[4,32], index: 3, kind: input, shape index: {}]   ;;  %s1645_s4 = inlined_call_operand.hbm [shape: f32[2,8,32], index: 4, kind: output, shape index: {}]  }
   0x1   :  { %1651 = sst [smem:[#allocation14_spill]] %s1643_s2 }
   0x2   :  { %9 = vsyncpa [#allocation6], 0 }
   0x3   :  { %11 = vsyncpa [#allocation6 + $0x1], 0 }
   0x4   :  { %12 = vsyncpa [#allocation7], 0 }
   0x5   :  { %14 = vsyncpa [#allocation7 + $0x1], 0  ;;  %s1369_s15 = smov 0   ;;  %s1371_s16 = smov 0  }
   0x6   :  { %s1373_s17 = smov 0   ;;  %s1375_s18 = smov 0  }
   0x7   :  { %s1377_s19 = smov 0   ;;  %s1379_s20 = smov 0  }
   0x8   :  { %s1381_s21 = smov 0   ;;  %s1383_s22 = smov 0  }
   0x9   :  { %s1385_s23 = smov 0   ;;  %s1387_s24 = smov 0  }
   0xa   :  { %s1389_s25 = smov 0  }
   0xb LB: > { %1652 = sst [smem:[#allocation11_spill]] %s1324_s24  ;;  %s921_s26 = sadd.s32 4294967295, %s1328_s25   ;;  %s1328_s25 = sphi %s1389_s25, %s20_s25   ;;  %s1324_s24 = sphi %s1387_s24, %s1666_s24   ;;  %s1320_s23 = sphi %s1385_s23, %s1674_s23   ;;  %s1316_s22 = sphi %s1383_s22, %s1664_s22   ;;  %s1312_s21 = sphi %s1381_s21, %s1673_s21   ;;  %s1308_s20 = sphi %s1379_s20, %s1672_s20   ;;  %s1304_s19 = sphi %s1377_s19, %s1671_s19   ;;  %s1300_s18 = sphi %s1375_s18, %s1670_s18   ;;  %s1296_s17 = sphi %s1373_s17, %s1669_s17   ;;  %s1292_s16 = sphi %s1371_s16, %s1668_s16   ;;  %s1288_s15 = sphi %s1369_s15, %s1667_s15  }
   0xc   : > { %s922_s27 = sadd.s32 4294967294, %s1328_s25   ;;  %s29_s28 = sadd.s32 1, %s1320_s23 }
   0xd   : > { %s32_s29 = sadd.s32 1, %s1324_s24  ;;  %p30_p0 = scmp.ge.s32.totalorder %s29_s28, 2 }
   0xe   : > { %s86_s30 = sadd.s32 1, %s1308_s20  ;;  %p93_p1 = scmp.ne.s32.totalorder %s1308_s20, %s1304_s19 }
   0xf   : > { %p94_p2 = scmp.eq.s32.totalorder %s1328_s25, 0  ;;  %s1676_s28 = smov (%p30_p0, %s29_s28), 0 }
  0x10   : > { %1653 = sst [smem:[#allocation12_spill]] %s1676_s28  ;;  %s1678_s29 = smov (!%p30_p0, %s32_s29), %s1324_s24 }
  0x11   : > { %s83_s5 = ssub.s32 %s1320_s23, %s1676_s28  ;;  %p1435_p3 = por %p94_p2, %p93_p1 }
  0x12   : > { %p34_p4 = scmp.ge.s32.totalorder %s1678_s29, 2  ;;  %p84_p5 = scmp.eq.s32.totalorder %s83_s5, 0 }
  0x13   : > { %p99_p6 = scmp.ne.s32.totalorder %s1304_s19, %s1300_s18  ;;  %p100_p7 = scmp.eq.s32.totalorder %s921_s26, 0 }
  0x14   : > { %s1680_s29 = smov (%p34_p4, %s1678_s29), 0  ;;  %s133_s10 = sadd.s32 1, %s1296_s17 }
  0x15   : > { %1655 = sst [smem:[#allocation13_spill]] %s1680_s29  ;;  %p1445_p8 = por %p100_p7, %p99_p6 }
  0x16   : > { %s1443_s7 = scalar_select %p84_p5, %s1308_s20, %s86_s30  }
  0x17   : > { %s130_s9 = ssub.s32 %s1324_s24, %s1680_s29  ;;  %p143_p10 = scmp.ne.s32.totalorder %s1296_s17, %s1292_s16 }
  0x18   : > { %p131_p9 = scmp.eq.s32.totalorder %s130_s9, 0  ;;  %p144_p11 = scmp.eq.s32.totalorder %s921_s26, 3 }
  0x19   : > { %p149_p13 = scmp.ne.s32.totalorder %s1292_s16, %s1288_s15  ;;  %p150_p0 = scmp.eq.s32.totalorder %s922_s27, 3 }
  0x1a   : > { %s1455_s11 = scalar_select %p131_p9, %s1296_s17, %s133_s10  }
  0x1b   : > { %p1457_p12 = por %p144_p11, %p143_p10  ;;  %p1064_p1 = scmp.lt.s32.totalorder %s1328_s25, 4 }
  0x1c   : > { %s183_s13 = sand.u32 1, %s1308_s20   ;;  %p1465_p2 = por %p150_p0, %p149_p13 }
  0x1d   : > { %s1657_s12 = scalar_select %p1457_p12, 1, 0 }
  0x1e   : > { %s1658_s14 = scalar_select %p1465_p2, 1, 0 }
  0x1f   : > { %s925_s18 = sshll.u32 %s183_s13, 6  ;;  %s962_s30 = sshll.u32 %s1320_s23, 10 }
  0x20   : > { %s1659_s2 = sld [smem:[#allocation14_spill]]  ;;  %s187_s10 = scalar_lea.vmem [#allocation5], %s925_s18 }
  0x21   : > { %s195_s29 = sshll.u32 %s187_s10, 4  ;;  %p1477_p4 = pnand %p1064_p1, %p1435_p3  ;;  %s1481_s29 = int_to_ptr.vmem [resolvable:$true] %s195_s29 }
  0x22   : > { %s1483_s28 = scalar_lea.sflag [#allocation6], %s183_s13 }
  0x23   : > { %p1178_p6 = pneg %p1477_p4 }
  0x26   : > { %s1473_s26 = scalar_lea.hbm %s1659_s2, %s962_s30  ;;  %s1181_s30 = scalar_lea.hbm %s1659_s2, 2048 }
  0x27   : > { %s1176_s5 = scalar_lea.hbm %s1473_s26, 1024  ;;  %p1182_p3 = scmp.lt.u32.totalorder %s1473_s26, %s1659_s2 }
  0x28   : > { %p1177_p5 = scmp.ne.s32.totalorder %s1473_s26, %s1176_s5  ;;  %p1183_p10 = scmp.lt.u32.totalorder %s1181_s30, %s1176_s5 }
  0x29   : > { %p1185_p13 = scmp.lt.u32.totalorder %s1176_s5, %s1473_s26 }
  0x2a   : > { %p1179_p7 = pnand %p1178_p6, %p1177_p5  ;;  %p1184_p11 = por %p1183_p10, %p1182_p3 }
  0x2c   : > { %p1180_p9 = pneg %p1179_p7  ;;  %p1186_p0 = por %p1185_p13, %p1184_p11 }
  0x2e   : > { %p1187_p1 = pnand %p1186_p0, %p1180_p9 }
  0x30   : > { %1190 = shalt.err (!%p1187_p1)
}
  0x31   : > { %s1191_s13 = scalar_lea.vmem %s1481_s29, 1024  ;;  %s1330_s18 = smov [#allocation5]  }
  0x32   : > { %p1192_p5 = scmp.ne.s32.totalorder %s1481_s29, %s1191_s13  ;;  %s1196_s6 = sshll.u32 %s1330_s18, 4  ;;  %s1197_s6 = int_to_ptr.vmem [resolvable:$false] %s1196_s6 }
  0x33   : > { %s1198_s9 = scalar_lea.vmem %s1197_s6, 2048  ;;  %p1199_p12 = scmp.lt.s32.totalorder %s1481_s29, %s1197_s6 }
  0x34   : > { %p1194_p7 = pnand %p1192_p5, %p1178_p6  ;;  %p1200_p3 = scmp.lt.s32.totalorder %s1198_s9, %s1191_s13 }
  0x36   : > { %p1195_p2 = pneg %p1194_p7  ;;  %p1201_p10 = por %p1200_p3, %p1199_p12 }
  0x38   : > { %p1202_p11 = pnand %p1201_p10, %p1195_p2 }
  0x3a   : > { %1205 = shalt.err (!%p1202_p11)
}
  0x3b   : > { %s1331_s5 = smov 128   ;;  %s1332_s30 = smov 8  }
  0x3c   : > { %1059 = dma.hbm_to_vmem [thread:$0]  (!%p1477_p4), %s1473_s26, 1024, %s1481_s29, %s1483_s28, %s1331_s5, %s1331_s5, %s1332_s30  }
  0x3d   : > { %p929_p6 = scmp.ge.s32.totalorder %s1328_s25, 1  ;;  %p203_p9 = scmp.lt.s32.totalorder %s1328_s25, 5 }
  0x3f   : > { %p204_p13 = pnand %p929_p6, %p203_p9 }
  0x40   : > { %s209_s10 = sand.u32 (!%p204_p13), 1, %s1304_s19  }
  0x41   : > { %207 = sbr.rel (%p204_p13) target bundleno = 1286 (0x506), region = 36  ;;  %s930_s13 = sshll.u32 (!%p204_p13), %s209_s10, 6 }
  0x42   : > { %s210_s18 = scalar_lea.sflag (!%p204_p13), [#allocation6], %s209_s10  ;;  %s1514_s6 = scalar_lea.vmem (!%p204_p13), [#allocation5], %s930_s13 }
  0x48   : > { %1279 = dma.done.wait (%p1445_p8), %s210_s18, 1024  }
  0x49   : > { %1281 = vsyncadd (%p1445_p8), %s210_s18, 4294966272  ;;  %s1649_s28 = sand.u32 1, %s1292_s16   ;;  %p242_p12 = scmp.lt.s32.totalorder %s1316_s22, 1 }
  0x4a   : > { %s1524_s29 = sshll.u32 %s1649_s28, 3  ;;  %p933_p2 = scmp.ne.s32.totalorder %s1312_s21, 0 }
  0x4b   : > { %s243_s26 = scalar_select %p242_p12, %s1316_s22, 1 }
  0x4c   : > { %s241_s10 = scalar_lea.vmem [#allocation8], %s1524_s29  ;;  %250 = sbr.rel (%p933_p2) target bundleno = 813 (0x32d), region = 44  ;;  %v252_v0 = vld [vmem:[%s1642_s1] sm:$0xff] (!%p933_p2)  ;;  %v253_v1 = vld [vmem:[%s1642_s1 + $0x8] sm:$0xff] (!%p933_p2)  ;;  %v254_v2 = vld [vmem:[%s1642_s1 + $0x10] sm:$0xff] (!%p933_p2)  ;;  %v1333_v3 = vmov (!%p933_p2), 0.0|0.0  }
  0x4d   : > { %s932_s27 = sshll.u32 %s243_s26, 3  ;;  %1034 = vmatprep.subr.bf16.mxu0 (!%p933_p2), %v1333_v3  ;;  %v1035_v4 = vpack.c.bf16 (!%p933_p2), %v253_v1, %v252_v0  ;;  %v255_v5 = vld [vmem:[%s1642_s1 + $0x18] sm:$0xff] (!%p933_p2)  ;;  %vm1334_vm0 = vmmov (!%p933_p2), 0   ;;  %v1335_v6 = vmov (!%p933_p2), 0.0   ;;  %vm256_vm1 = vcmask (!%p933_p2), 261120  }
  0x4e   : > { %s245_s30 = scalar_lea.vmem %s1641_s0, %s932_s27  ;;  %994 = vmatprep.mubr.msk.f32.mxu0 (!%p933_p2), %vm1334_vm0, %v1335_v6  ;;  %997 = vmatprep.subr.mxu1 (!%p933_p2), %v1335_v6  ;;  %v1038_v8 = vpack.c.bf16 (!%p933_p2), %v255_v5, %v254_v2  ;;  %vm330_vm2 = vcmask (!%p933_p2), 64512   ;;  %v1336_v22 = vmov (!%p933_p2), 1.0   ;;  %v1337_v28 = vmov (!%p933_p2), 0  }
  0x4f   : > { %v251_v7 = vld [vmem:[%s245_s30] sm:$0xff] (!%p933_p2)  ;;  %999 = vmatprep.mubr.msk.f32.mxu1 (!%p933_p2), %vm1334_vm0, %v1335_v6  ;;  %1036 = vmatpush3.bf16.msra.mxu0 (!%p933_p2), %v1035_v4 }
  0x50   : > { %998 = vmatpush3.msra.mxu1 (!%p933_p2), %v251_v7  ;;  %1037 = vmatprep.subr.bf16.mxu0 (!%p933_p2), %v1333_v3 }
  0x51   : > { %1002 = vmatprep.subr.mxu1 (!%p933_p2), %v1335_v6  ;;  %1166 = vset.pattern.permute.xlu1 (!%p933_p2), %v1337_v28 }
  0x53   : > { %1039 = vmatpush3.bf16.msra.mxu0 %v1038_v8 }
  0x56   : > { %995 = vmatmul.mubr.msk.f32.vlgmr.msra.gmra.mrb[0].mxu0 %vm256_vm1, %v251_v7 }
 0x129   : > { %v326_v9 = vpop.f32.mrb[0].mxu0 }
 0x12a   : > { %v331_v10 = vsel %vm330_vm2, %v326_v9, -inf  ;;  %v996_v11 = vpop.f32.mrb[1].mxu0 }
 0x12b   : > { %v332_v12 = vrot.slane %v331_v10, 4 }
 0x12d   : > { %v333_v13 = vmax.f32 %v331_v10, %v332_v12 }
 0x12f   : > { %v334_v14 = vrot.slane %v333_v13, 2 }
 0x131   : > { %v335_v15 = vmax.f32 %v333_v13, %v334_v14 }
 0x133   : > { %v336_v16 = vrot.slane %v335_v15, 1 }
 0x135   : > { %v337_v17 = vmax.f32 %v335_v15, %v336_v16 }
 0x137   : > { %v338_v18 = vsub.f32 %v326_v9, %v337_v17 }
 0x139   : > { %v339_v19 = vmul.f32 1.442695, %v338_v18 }
 0x13b   : > { %1168 = vpow2.f32 %v339_v19 }
 0x145   : > { %v1169_v20 = vpop.eup %1168 }
 0x146   : > { %341 = vxpose.xlu0.b32.start.end [1/1] (short) (narrow) %v1169_v20, 8 }
 0x16f   : > { %1167 = vset.pattern.permute.xlu0 %v1337_v28 }
 0x173   : > { %524 = vmax.xlane.f32.xlu0 %v331_v10 }
 0x1c6   : > { %v357_v21 = vpop.trf.xlu0 }
 0x1c7   : > { %1000 = vmatmul.mubr.msk.f32.vlgmr.msra.gmra.mrb[0].mxu1 %vm330_vm2, %v357_v21 }
 0x1c8   : > { %1003 = vmatpush3.msra.mxu1 %v1336_v22  ;;  %1004 = vmatprep.mubr.msk.f32.mxu1 %vm1334_vm0, %v1335_v6 }
 0x1cb   : > { %1005 = vmatmul.mubr.msk.f32.vlgmr.msra.gmra.mrb[2].mxu1 %vm330_vm2, %v357_v21 }
 0x200   : > { %v525_v23 = vpop.xlane.xlu0 %524 }
 0x201   : > { %v526_v24 = vsub.f32 %v326_v9, %v525_v23 }
 0x203   : > { %v527_v25 = vmul.f32 1.442695, %v526_v24 }
 0x205   : > { %1170 = vpow2.f32 %v527_v25 }
 0x20f   : > { %v1171_v26 = vpop.eup %1170 }
 0x210   : > { %v529_v27 = vsel %vm330_vm2, %v1171_v26, 0.0 }
 0x211   : > { %530 = vadd.xlane.f32.xlu1 %v529_v27 }
 0x29a   : > { %v442_v29 = vpop.f32.mrb[0].mxu1 }
 0x29b   : > { %v1001_v30 = vpop.f32.mrb[1].mxu1 }
 0x29e   : > { %v512_v31 = vpop.f32.mrb[2].mxu1  ;;  %v531_v32 = vpop.xlane.xlu1 %530 }
 0x29f   : > { %1172 = vrcp.f32 %v512_v31  ;;  %v1006_v33 = vpop.f32.mrb[3].mxu1 }
 0x2a0   : > { %1174 = vrcp.f32 %v531_v32 }
 0x2a9   : > { %v1173_v34 = vpop.eup %1172 }
 0x2aa   : > { %v1175_v35 = vpop.eup %1174  ;;  %519 = vperm.xlu1 %1166, %v1173_v34  }
 0x2ab   : > { %v533_v36 = vmul.f32 %v1175_v35, %v1171_v26 }
 0x2ad   : > { %534 = vst.msk [vmem:[#allocation4] sm:$0xff] %vm330_vm2, %v533_v36 }
 0x329   : > { %v520_v37 = vpop.permute.xlu1 %519 }
 0x32a   : > { %v522_v38 = vmul.f32 %v520_v37, %v442_v29 }
 0x32c   : > { %523 = vst.msk [vmem:[#allocation2] sm:$0xff] %vm256_vm1, %v522_v38 }
 0x32d PF: > { %v537_v39 = vld [vmem:[%s1514_s6] sm:$0xff]  ;;  %v538_v40 = vld [vmem:[%s1514_s6 + $0x8] sm:$0xff]  ;;  %v1338_v42 = vmov 0.0|0.0   ;;  %v539_v45 = vld [vmem:[%s1514_s6 + $0x10] sm:$0xff]  ;;  %s938_s2 = sshll.u32 %s1312_s21, 2  ;;  %vm1339_vm3 = vmmov 0  }
 0x32e   : > { %v941_v41 = vld [vmem:[%s1514_s6 + $0x20] sm:$0xff]  ;;  %1040 = vmatprep.subr.bf16.mxu0 %v1338_v42  ;;  %1046 = vmatprep.subr.bf16.mxu1 %v1338_v42  ;;  %v1041_v43 = vpack.c.bf16 %v538_v40, %v537_v39  ;;  %v942_v44 = vld [vmem:[%s1514_s6 + $0x28] sm:$0xff]  ;;  %v540_v46 = vld [vmem:[%s1514_s6 + $0x18] sm:$0xff]  ;;  %v1340_v50 = vmov 0.0   ;;  %s541_s24 = scalar_lea.vmem [#allocation2], %s938_s2  ;;  %vm549_vm4 = vcmask 261120  }
 0x32f   : > { %v1047_v47 = vpack.c.bf16 %v942_v44, %v941_v41  ;;  %v943_v48 = vld [vmem:[%s1514_s6 + $0x30] sm:$0xff]  ;;  %v944_v49 = vld [vmem:[%s1514_s6 + $0x38] sm:$0xff]  ;;  %1015 = vmatprep.mubr.msk.f32.mxu0 %vm1339_vm3, %v1340_v50  ;;  %1026 = vmatprep.mubr.msk.f32.mxu1 %vm1339_vm3, %v1340_v50  ;;  %v1044_v51 = vpack.c.bf16 %v540_v46, %v539_v45  ;;  %s937_s6 = sshll.u32 %s1312_s21, 1  ;;  %vm624_vm5 = vcmask 254976   ;;  %s623_s30 = scalar_lea.vmem [#allocation3], %s938_s2 }
 0x330   : > { %1042 = vmatpush3.bf16.msra.mxu0 %v1041_v43  ;;  %v1050_v52 = vpack.c.bf16 %v944_v49, %v943_v48  ;;  %s543_s5 = scalar_lea.vmem %s1644_s3, %s937_s6  ;;  %p955_p8 = scmp.ne.s32.totalorder %s1312_s21, 1 }
 0x331   : > { %1048 = vmatpush3.bf16.msra.mxu1 %v1047_v47  ;;  %1043 = vmatprep.subr.bf16.mxu0 %v1338_v42  ;;  %v939_v55 = vld [vmem:[%s543_s5] ss:$0 sm:$0xff]  ;;  %v950_v56 = vld [vmem:[%s543_s5 + $0x1] ss:$0 sm:$0xff]  ;;  %v720_v0 = vld [vmem:[#allocation4] sm:$0xff] (!%p955_p8)  ;;  %vm722_vm6 = vcmask (!%p955_p8), 64512  }
 0x332   : > { %1049 = vmatprep.subr.bf16.mxu1 %v1338_v42  ;;  %v1341_v1 = vmov (!%p955_p8), 0.0   ;;  %vm1342_vm7 = vmmov (!%p955_p8), 0  }
 0x333   : > { %v542_v53 = vld [vmem:[%s541_s24] sm:$0x3]  ;;  %v947_v54 = vld [vmem:[%s541_s24 + $0x2] sm:$0x3] }
 0x334   : > { %1045 = vmatpush3.bf16.msra.mxu0 %v1044_v51 }
 0x335   : > { %1051 = vmatpush3.bf16.msra.mxu1 %v1050_v52  ;;  %1029 = vmatprep.subr.mxu0 (!%p955_p8), %v1341_v1 }
 0x337   : > { %1016 = vmatmul.mubr.msk.f32.vlgmr.msra.gmra.mrb[0].mxu0 %vm549_vm4, %v542_v53 }
 0x338   : > { %1027 = vmatmul.mubr.msk.f32.vlgmr.msra.gmra.mrb[0].mxu1 %vm549_vm4, %v947_v54  ;;  %1031 = vmatprep.mubr.msk.f32.mxu0 (!%p955_p8), %vm1342_vm7, %v1341_v1 }
 0x408   : > { %719 = sbr.rel (%p955_p8) target bundleno = 1260 (0x4ec), region = 48 }
 0x40a   : > { %v619_v57 = vpop.f32.mrb[0].mxu0 }
 0x40b   : > { %v620_v58 = vadd.f32 %v939_v55, %v619_v57  ;;  %v710_v59 = vpop.f32.mrb[0].mxu1  ;;  %v1017_v60 = vpop.f32.mrb[1].mxu0 }
 0x40c   : > { %v711_v61 = vadd.f32 %v950_v56, %v710_v59  ;;  %v1028_v62 = vpop.f32.mrb[1].mxu1 }
 0x40d   : > { %625 = vst.msk [vmem:[%s623_s30] sm:$0x3] %vm624_vm5, %v620_v58 }
 0x40e   : > { %954 = vst.msk [vmem:[%s623_s30 + $0x2] sm:$0x3] %vm624_vm5, %v711_v61 }
 0x415   : > { %v721_v63 = vld [vmem:[#allocation3] sm:$0xff] }
 0x416   : > { %1030 = vmatpush3.msra.mxu0 %v721_v63 }
 0x417   : > { %1032 = vmatmul.mubr.msk.f32.vlgmr.msra.gmra.mrb[0].mxu0 %vm722_vm6, %v720_v0 }
 0x4ea   : > { %v792_v2 = vpop.f32.mrb[0].mxu0 }
 0x4eb   : > { %796 = vst.msk [vmem:[%s241_s10] sm:$0xff] %vm549_vm4, %v792_v2  ;;  %v1033_v3 = vpop.f32.mrb[1].mxu0 }
 0x4ec PF: > { %s958_s21 = sshll.u32 %s1316_s22, 7  ;;  %s811_s26 = sshll.u32 %s241_s10, 4  ;;  %s812_s26 = int_to_ptr.vmem [resolvable:$true] %s811_s26 }
 0x4ed   : > { %s1581_s18 = scalar_lea.hbm %s1645_s4, %s958_s21  ;;  %s1661_s27 = sand.u32 1, %s1292_s16  }
 0x4ee   : > { %s798_s2 = scalar_lea.sflag [#allocation7], %s1661_s27  ;;  %s1206_s24 = scalar_lea.vmem %s812_s26, 128 }
 0x4ef   : > { %p1207_p4 = scmp.ne.s32.totalorder %s812_s26, %s1206_s24  ;;  %p1662_p0 = scmp.ne.s32.totalorder %s1657_s12, 0 }
 0x4f0   : > { %s1343_s6 = smov [#allocation8]  }
 0x4f1   : > { %p1208_p1 = pnand %p1207_p4, %p1662_p0  ;;  %s1210_s28 = sshll.u32 %s1343_s6, 4  ;;  %s1211_s28 = int_to_ptr.vmem [resolvable:$false] %s1210_s28 }
 0x4f2   : > { %s1212_s9 = scalar_lea.vmem %s1211_s28, 256  ;;  %p1213_p7 = scmp.lt.s32.totalorder %s812_s26, %s1211_s28 }
 0x4f3   : > { %p1209_p5 = pneg %p1208_p1  ;;  %p1214_p3 = scmp.lt.s32.totalorder %s1212_s9, %s1206_s24 }
 0x4f5   : > { %p1215_p10 = por %p1214_p3, %p1213_p7 }
 0x4f7   : > { %p1216_p11 = pnand %p1215_p10, %p1209_p5 }
 0x4f9   : > { %1219 = shalt.err (!%p1216_p11)
}
 0x4fa   : > { %s1220_s22 = scalar_lea.hbm %s1581_s18, 128  ;;  %s1224_s5 = scalar_lea.hbm %s1645_s4, 256 }
 0x4fb   : > { %p1221_p6 = scmp.ne.s32.totalorder %s1581_s18, %s1220_s22  ;;  %p1225_p12 = scmp.lt.u32.totalorder %s1581_s18, %s1645_s4 }
 0x4fc   : > { %p1226_p2 = scmp.lt.u32.totalorder %s1224_s5, %s1220_s22  ;;  %p1228_p4 = scmp.lt.u32.totalorder %s1220_s22, %s1581_s18 }
 0x4fd   : > { %p1222_p9 = pnand %p1221_p6, %p1662_p0 }
 0x4fe   : > { %p1227_p8 = por %p1226_p2, %p1225_p12 }
 0x4ff   : > { %p1223_p13 = pneg %p1222_p9 }
 0x500   : > { %p1229_p1 = por %p1228_p4, %p1227_p8 }
 0x502   : > { %p1230_p5 = pnand %p1229_p1, %p1223_p13 }
 0x504   : > { %1233 = shalt.err (!%p1230_p5)
}
 0x505   : > { %1054 = dma.vmem_to_hbm [thread:$0]  (%p1662_p0), %s812_s26, 128, %s1581_s18, %s798_s2  }
 0x506 PF: > { %p1065_p7 = scmp.ge.s32.totalorder %s1328_s25, 2  ;;  %s823_s8 = sand.u32 1, %s1288_s15  }
 0x507   : > { %p1663_p3 = scmp.ne.s32.totalorder %s1658_s14, 0  ;;  %s824_s13 = scalar_lea.sflag [#allocation7], %s823_s8 }
 0x509   : > { %p1061_p10 = pnand %p1065_p7, %p1663_p3 }
 0x50b   : > { %1283 = dma.done.wait (!%p1061_p10), %s824_s13, 128  }
 0x50c   : > { %1285 = vsyncadd (!%p1061_p10), %s824_s13, 4294967168  ;;  %s20_s25 = sadd.s32 1, %s1328_s25   ;;  %s1664_s22 = sld [smem:[#allocation11_spill]] }
 0x50d   : > { %p17_p11 = scmp.ge.s32.totalorder %s20_s25, 6   ;;  %s1665_s12 = sld [smem:[#allocation12_spill]] }
 0x50e   : > { %s1666_s24 = sld [smem:[#allocation13_spill]]  ;;  %s1667_s15 = smov %s1292_s16 }
 0x50f   : > { %s1668_s16 = smov %s1296_s17  ;;  %s1669_s17 = smov %s1455_s11 }
 0x510   : > { %s1670_s18 = smov %s1304_s19  ;;  %s1671_s19 = smov %s1308_s20 }
 0x511   : > { %s1672_s20 = smov %s1443_s7  ;;  %s1673_s21 = smov %s1320_s23 }
 0x512   :  { %19 = sbr.rel (!%p17_p11) target bundleno = 11 (0xb), region = 99 }
 0x513   : > { %s1674_s23 = smov %s1665_s12 }
 0x519   :  { %829 = vsyncpa [#allocation6], 1 }
 0x51a   :  { %831 = vsyncpa [#allocation6 + $0x1], 1 }
 0x51b   :  { %832 = vsyncpa [#allocation7], 1 }
 0x51c   :  { %834 = vsyncpa [#allocation7 + $0x1], 1 }

</bundles_post_ra>
